<compile_context>
chip_gen: v7x
topology: tpu7x:2x2x1
jax: 0.10.0
libtpu: 0.0.40
codegen_flags: <defaults>
</compile_context>

<pallas_src>
import functools
from math import sqrt

import jax
import jax.numpy as jnp
import numpy as np
from jax.experimental import pallas as pl
from jax.experimental.pallas import tpu as pltpu


def _equalized_conv2d_kernel(x_ref, w_ref, b_ref, o_ref, *, KH, KW, Wp, Lout):
    # x_ref: (1, Cin, Lc)          flat zero-padded canvas, Lc = (Hp+1)*Wp
    # w_ref: (KH, KW, Cout, Cin)   pre-scaled weights, per-tap (Cout, Cin)
    # b_ref: (Cout, 1)
    # o_ref: (1, Cout, Lout)       Lout = Ho*Wp  (lane-dense flat output)
    xf = x_ref[0]                                    # (Cin, Lc)
    cout = w_ref.shape[2]

    # Init accumulator with the bias (saves a full-accumulator add at the end).
    acc = jnp.broadcast_to(b_ref[...], (cout, Lout)).astype(jnp.float32)

    # Shift-and-matmul: each tap is a static lane-offset slice (no relayout)
    # feeding an MXU matmul with spatial on lanes.
    for kh in range(KH):
        for kw in range(KW):
            off = kh * Wp + kw
            rhs = xf[:, off:off + Lout]              # (Cin, Lout)
            acc = acc + jnp.dot(w_ref[kh, kw], rhs,
                                preferred_element_type=jnp.float32)

    o_ref[0] = acc.astype(o_ref.dtype)               # unmasked lane-dense store


def equalized_conv2d(x, weight, bias, padding):
    """x: (N, Cin, H, W) float32 (NCHW, like PyTorch). Returns (N, Cout, Ho, Wo)."""
    N, Cin, H, W = x.shape
    Cout, _, KH, KW = weight.shape
    Ho = H + 2 * padding - KH + 1
    Wo = W + 2 * padding - KW + 1
    Hp = H + 2 * padding
    Wp = W + 2 * padding

    # Equalized learning-rate scaling (EqualizedWeight.forward).
    c = 1.0 / sqrt(Cin * KH * KW)

    # Single data-movement op on the activation: zero-pad the spatial dims
    # (plus one extra zero row at the bottom so the last tap's flat slice stays
    # in bounds); the flatten afterwards is contiguous => free.
    x_canvas = jnp.pad(
        x, ((0, 0), (0, 0), (padding, padding + 1), (padding, padding)))
    Lc = (Hp + 1) * Wp
    x_canvas = x_canvas.reshape(N, Cin, Lc)

    # Tiny weight/bias reshuffles (negligible HBM traffic).
    w = jnp.transpose(weight.astype(jnp.float32) * c, (2, 3, 0, 1))  # (KH,KW,Cout,Cin)
    b = bias.astype(jnp.float32).reshape(Cout, 1)

    Lout = Ho * Wp

    kernel = functools.partial(_equalized_conv2d_kernel,
                               KH=KH, KW=KW, Wp=Wp, Lout=Lout)

    out_flat = pl.pallas_call(
        kernel,
        out_shape=jax.ShapeDtypeStruct((N, Cout, Lout), x.dtype),
        grid=(N,),
        in_specs=[
            pl.BlockSpec((1, Cin, Lc), lambda n: (n, 0, 0)),
            pl.BlockSpec((KH, KW, Cout, Cin), lambda n: (0, 0, 0, 0)),
            pl.BlockSpec((Cout, 1), lambda n: (0, 0)),
        ],
        out_specs=pl.BlockSpec((1, Cout, Lout), lambda n: (n, 0, 0)),
        compiler_params=pltpu.CompilerParams(
            dimension_semantics=("parallel",),
            vmem_limit_bytes=32 * 1024 * 1024),
    )(x_canvas, w, b)

    # Free reshape, then drop the KW-1 garbage columns per output row.
    out = out_flat.reshape(N, Cout, Ho, Wp)[:, :, :, :Wo]
    return out


if __name__ == "__main__":
    key = jax.random.PRNGKey(0)
    kx, kw = jax.random.split(key)

    # Module config (small, consistent with the forward pass).
    N, Cin, H, W = 2, 4, 16, 16
    Cout, K, padding = 8, 3, 1

    # Deterministic synthetic parameters (EqualizedConv2d.__init__ shapes).
    x = jax.random.normal(kx, (N, Cin, H, W), dtype=jnp.float32)
    weight = jax.random.normal(kw, (Cout, Cin, K, K), dtype=jnp.float32)
    bias = jnp.ones((Cout,), dtype=jnp.float32)

    out = equalized_conv2d(x, weight, bias, padding)
    out = jax.block_until_ready(out)

    # Pure-JAX reference (same math as F.conv2d(x, weight*c, bias, padding)).
    c = 1.0 / sqrt(Cin * K * K)
    ref = jax.lax.conv_general_dilated(
        x, weight * c, window_strides=(1, 1),
        padding=((padding, padding), (padding, padding)),
        dimension_numbers=("NCHW", "OIHW", "NCHW"),
    ) + bias[None, :, None, None]

    np.testing.assert_allclose(np.asarray(out), np.asarray(ref),
                               rtol=1e-4, atol=1e-4)
    print("KERNEL_OK")
</pallas_src>

<mosaic_0001>
module attributes {stable_mosaic.version = 11 : i64} {
  func.func @_equalized_conv2d_kernel(%arg0: i32, %arg1: memref<1x4x342xf32, #tpu.memory_space<vmem>>, %arg2: memref<3x3x8x4xf32, #tpu.memory_space<vmem>>, %arg3: memref<8x1xf32, #tpu.memory_space<vmem>>, %arg4: memref<1x8x288xf32, #tpu.memory_space<vmem>>) attributes {dimension_semantics = [#tpu.dimension_semantics<parallel>], iteration_bounds = array<i64: 2>, scalar_prefetch = 0 : i64, scratch_operands = 0 : i64, tpu.core_type = #tpu.core_type<tc>, window_params = [{transform_indices = @transform_0, window_bounds = array<i64: 1, 4, 342>}, {pipeline_mode = #tpu.pipeline_mode<synchronous>, transform_indices = @transform_1, window_bounds = array<i64: 3, 3, 8, 4>}, {pipeline_mode = #tpu.pipeline_mode<synchronous>, transform_indices = @transform_2, window_bounds = array<i64: 8, 1>}, {transform_indices = @transform_3, window_bounds = array<i64: 1, 8, 288>}]} {
    %c0 = arith.constant 0 : index
    %c0_0 = arith.constant 0 : index
    %c0_1 = arith.constant 0 : index
    %0 = vector.load %arg1[%c0, %c0_0, %c0_1] : memref<1x4x342xf32, #tpu.memory_space<vmem>>, vector<1x4x342xf32>
    %1 = vector.shape_cast %0 : vector<1x4x342xf32> to vector<4x342xf32>
    %c0_2 = arith.constant 0 : index
    %c0_3 = arith.constant 0 : index
    %2 = vector.load %arg3[%c0_2, %c0_3] : memref<8x1xf32, #tpu.memory_space<vmem>>, vector<8x1xf32>
    %3 = vector.shape_cast %2 : vector<8x1xf32> to vector<8x1xf32>
    %4 = vector.broadcast %3 : vector<8x1xf32> to vector<8x288xf32>
    %5 = vector.extract_strided_slice %1 {offsets = [0, 0], sizes = [4, 288], strides = [1, 1]} : vector<4x342xf32> to vector<4x288xf32>
    %c0_4 = arith.constant 0 : index
    %c0_5 = arith.constant 0 : index
    %c0_6 = arith.constant 0 : index
    %c0_7 = arith.constant 0 : index
    %6 = vector.load %arg2[%c0_4, %c0_5, %c0_6, %c0_7] : memref<3x3x8x4xf32, #tpu.memory_space<vmem>>, vector<1x1x8x4xf32>
    %7 = vector.shape_cast %6 : vector<1x1x8x4xf32> to vector<8x4xf32>
    %cst = arith.constant dense<0.000000e+00> : vector<8x288xf32>
    %8 = tpu.matmul %7, %5, %cst {dimension_numbers = #tpu.dot_dimension_numbers<[1], [0], [0], [1], [0, 0, 1, 1], [], []>} : vector<8x4xf32>, vector<4x288xf32>, vector<8x288xf32> -> vector<8x288xf32>
    %9 = arith.addf %4, %8 : vector<8x288xf32>
    %10 = vector.extract_strided_slice %1 {offsets = [0, 1], sizes = [4, 288], strides = [1, 1]} : vector<4x342xf32> to vector<4x288xf32>
    %c0_8 = arith.constant 0 : index
    %c1 = arith.constant 1 : index
    %c0_9 = arith.constant 0 : index
    %c0_10 = arith.constant 0 : index
    %11 = vector.load %arg2[%c0_8, %c1, %c0_9, %c0_10] : memref<3x3x8x4xf32, #tpu.memory_space<vmem>>, vector<1x1x8x4xf32>
    %12 = vector.shape_cast %11 : vector<1x1x8x4xf32> to vector<8x4xf32>
    %cst_11 = arith.constant dense<0.000000e+00> : vector<8x288xf32>
    %13 = tpu.matmul %12, %10, %cst_11 {dimension_numbers = #tpu.dot_dimension_numbers<[1], [0], [0], [1], [0, 0, 1, 1], [], []>} : vector<8x4xf32>, vector<4x288xf32>, vector<8x288xf32> -> vector<8x288xf32>
    %14 = arith.addf %9, %13 : vector<8x288xf32>
    %15 = vector.extract_strided_slice %1 {offsets = [0, 2], sizes = [4, 288], strides = [1, 1]} : vector<4x342xf32> to vector<4x288xf32>
    %c0_12 = arith.constant 0 : index
    %c2 = arith.constant 2 : index
    %c0_13 = arith.constant 0 : index
    %c0_14 = arith.constant 0 : index
    %16 = vector.load %arg2[%c0_12, %c2, %c0_13, %c0_14] : memref<3x3x8x4xf32, #tpu.memory_space<vmem>>, vector<1x1x8x4xf32>
    %17 = vector.shape_cast %16 : vector<1x1x8x4xf32> to vector<8x4xf32>
    %cst_15 = arith.constant dense<0.000000e+00> : vector<8x288xf32>
    %18 = tpu.matmul %17, %15, %cst_15 {dimension_numbers = #tpu.dot_dimension_numbers<[1], [0], [0], [1], [0, 0, 1, 1], [], []>} : vector<8x4xf32>, vector<4x288xf32>, vector<8x288xf32> -> vector<8x288xf32>
    %19 = arith.addf %14, %18 : vector<8x288xf32>
    %20 = vector.extract_strided_slice %1 {offsets = [0, 18], sizes = [4, 288], strides = [1, 1]} : vector<4x342xf32> to vector<4x288xf32>
    %c1_16 = arith.constant 1 : index
    %c0_17 = arith.constant 0 : index
    %c0_18 = arith.constant 0 : index
    %c0_19 = arith.constant 0 : index
    %21 = vector.load %arg2[%c1_16, %c0_17, %c0_18, %c0_19] : memref<3x3x8x4xf32, #tpu.memory_space<vmem>>, vector<1x1x8x4xf32>
    %22 = vector.shape_cast %21 : vector<1x1x8x4xf32> to vector<8x4xf32>
    %cst_20 = arith.constant dense<0.000000e+00> : vector<8x288xf32>
    %23 = tpu.matmul %22, %20, %cst_20 {dimension_numbers = #tpu.dot_dimension_numbers<[1], [0], [0], [1], [0, 0, 1, 1], [], []>} : vector<8x4xf32>, vector<4x288xf32>, vector<8x288xf32> -> vector<8x288xf32>
    %24 = arith.addf %19, %23 : vector<8x288xf32>
    %25 = vector.extract_strided_slice %1 {offsets = [0, 19], sizes = [4, 288], strides = [1, 1]} : vector<4x342xf32> to vector<4x288xf32>
    %c1_21 = arith.constant 1 : index
    %c1_22 = arith.constant 1 : index
    %c0_23 = arith.constant 0 : index
    %c0_24 = arith.constant 0 : index
    %26 = vector.load %arg2[%c1_21, %c1_22, %c0_23, %c0_24] : memref<3x3x8x4xf32, #tpu.memory_space<vmem>>, vector<1x1x8x4xf32>
    %27 = vector.shape_cast %26 : vector<1x1x8x4xf32> to vector<8x4xf32>
    %cst_25 = arith.constant dense<0.000000e+00> : vector<8x288xf32>
    %28 = tpu.matmul %27, %25, %cst_25 {dimension_numbers = #tpu.dot_dimension_numbers<[1], [0], [0], [1], [0, 0, 1, 1], [], []>} : vector<8x4xf32>, vector<4x288xf32>, vector<8x288xf32> -> vector<8x288xf32>
    %29 = arith.addf %24, %28 : vector<8x288xf32>
    %30 = vector.extract_strided_slice %1 {offsets = [0, 20], sizes = [4, 288], strides = [1, 1]} : vector<4x342xf32> to vector<4x288xf32>
    %c1_26 = arith.constant 1 : index
    %c2_27 = arith.constant 2 : index
    %c0_28 = arith.constant 0 : index
    %c0_29 = arith.constant 0 : index
    %31 = vector.load %arg2[%c1_26, %c2_27, %c0_28, %c0_29] : memref<3x3x8x4xf32, #tpu.memory_space<vmem>>, vector<1x1x8x4xf32>
    %32 = vector.shape_cast %31 : vector<1x1x8x4xf32> to vector<8x4xf32>
    %cst_30 = arith.constant dense<0.000000e+00> : vector<8x288xf32>
    %33 = tpu.matmul %32, %30, %cst_30 {dimension_numbers = #tpu.dot_dimension_numbers<[1], [0], [0], [1], [0, 0, 1, 1], [], []>} : vector<8x4xf32>, vector<4x288xf32>, vector<8x288xf32> -> vector<8x288xf32>
    %34 = arith.addf %29, %33 : vector<8x288xf32>
    %35 = vector.extract_strided_slice %1 {offsets = [0, 36], sizes = [4, 288], strides = [1, 1]} : vector<4x342xf32> to vector<4x288xf32>
    %c2_31 = arith.constant 2 : index
    %c0_32 = arith.constant 0 : index
    %c0_33 = arith.constant 0 : index
    %c0_34 = arith.constant 0 : index
    %36 = vector.load %arg2[%c2_31, %c0_32, %c0_33, %c0_34] : memref<3x3x8x4xf32, #tpu.memory_space<vmem>>, vector<1x1x8x4xf32>
    %37 = vector.shape_cast %36 : vector<1x1x8x4xf32> to vector<8x4xf32>
    %cst_35 = arith.constant dense<0.000000e+00> : vector<8x288xf32>
    %38 = tpu.matmul %37, %35, %cst_35 {dimension_numbers = #tpu.dot_dimension_numbers<[1], [0], [0], [1], [0, 0, 1, 1], [], []>} : vector<8x4xf32>, vector<4x288xf32>, vector<8x288xf32> -> vector<8x288xf32>
    %39 = arith.addf %34, %38 : vector<8x288xf32>
    %40 = vector.extract_strided_slice %1 {offsets = [0, 37], sizes = [4, 288], strides = [1, 1]} : vector<4x342xf32> to vector<4x288xf32>
    %c2_36 = arith.constant 2 : index
    %c1_37 = arith.constant 1 : index
    %c0_38 = arith.constant 0 : index
    %c0_39 = arith.constant 0 : index
    %41 = vector.load %arg2[%c2_36, %c1_37, %c0_38, %c0_39] : memref<3x3x8x4xf32, #tpu.memory_space<vmem>>, vector<1x1x8x4xf32>
    %42 = vector.shape_cast %41 : vector<1x1x8x4xf32> to vector<8x4xf32>
    %cst_40 = arith.constant dense<0.000000e+00> : vector<8x288xf32>
    %43 = tpu.matmul %42, %40, %cst_40 {dimension_numbers = #tpu.dot_dimension_numbers<[1], [0], [0], [1], [0, 0, 1, 1], [], []>} : vector<8x4xf32>, vector<4x288xf32>, vector<8x288xf32> -> vector<8x288xf32>
    %44 = arith.addf %39, %43 : vector<8x288xf32>
    %45 = vector.extract_strided_slice %1 {offsets = [0, 38], sizes = [4, 288], strides = [1, 1]} : vector<4x342xf32> to vector<4x288xf32>
    %c2_41 = arith.constant 2 : index
    %c2_42 = arith.constant 2 : index
    %c0_43 = arith.constant 0 : index
    %c0_44 = arith.constant 0 : index
    %46 = vector.load %arg2[%c2_41, %c2_42, %c0_43, %c0_44] : memref<3x3x8x4xf32, #tpu.memory_space<vmem>>, vector<1x1x8x4xf32>
    %47 = vector.shape_cast %46 : vector<1x1x8x4xf32> to vector<8x4xf32>
    %cst_45 = arith.constant dense<0.000000e+00> : vector<8x288xf32>
    %48 = tpu.matmul %47, %45, %cst_45 {dimension_numbers = #tpu.dot_dimension_numbers<[1], [0], [0], [1], [0, 0, 1, 1], [], []>} : vector<8x4xf32>, vector<4x288xf32>, vector<8x288xf32> -> vector<8x288xf32>
    %49 = arith.addf %44, %48 : vector<8x288xf32>
    %c0_46 = arith.constant 0 : index
    %c0_47 = arith.constant 0 : index
    %c0_48 = arith.constant 0 : index
    %50 = vector.load %arg4[%c0_46, %c0_47, %c0_48] : memref<1x8x288xf32, #tpu.memory_space<vmem>>, vector<1x8x288xf32>
    %51 = vector.shape_cast %50 : vector<1x8x288xf32> to vector<8x288xf32>
    %52 = vector.shape_cast %49 : vector<8x288xf32> to vector<1x8x288xf32>
    tpu.vector_store %arg4[%c0_46, %c0_47, %c0_48], %52 {strides = array<i32>} : memref<1x8x288xf32, #tpu.memory_space<vmem>>, vector<1x8x288xf32>,
    return
  }
  func.func @transform_0(%arg0: i32) -> (i32, i32, i32) {
    %c0_i32 = arith.constant 0 : i32
    %c0_i32_0 = arith.constant 0 : i32
    %c0_i32_1 = arith.constant 0 : i32
    return %arg0, %c0_i32, %c0_i32_0 : i32, i32, i32
  }
  func.func @transform_1(%arg0: i32) -> (i32, i32, i32, i32) {
    %c0_i32 = arith.constant 0 : i32
    %c0_i32_0 = arith.constant 0 : i32
    %c0_i32_1 = arith.constant 0 : i32
    %c0_i32_2 = arith.constant 0 : i32
    %c0_i32_3 = arith.constant 0 : i32
    return %c0_i32, %c0_i32_0, %c0_i32_1, %c0_i32_2 : i32, i32, i32, i32
  }
  func.func @transform_2(%arg0: i32) -> (i32, i32) {
    %c0_i32 = arith.constant 0 : i32
    %c0_i32_0 = arith.constant 0 : i32
    %c0_i32_1 = arith.constant 0 : i32
    return %c0_i32, %c0_i32_0 : i32, i32
  }
  func.func @transform_3(%arg0: i32) -> (i32, i32, i32) {
    %c0_i32 = arith.constant 0 : i32
    %c0_i32_0 = arith.constant 0 : i32
    %c0_i32_1 = arith.constant 0 : i32
    return %arg0, %c0_i32, %c0_i32_0 : i32, i32, i32
  }
}

</mosaic_0001>

<bundles_post_ra>
// kernel: tpu_custom_call.1
= control target key start
LH: loop header
LB: loop body
LE: loop exit
PB: predicated region body
PF: predicated region fallthrough
CT: control target
= control target key end

     0   :  { %8 = vsyncpa [#allocation3], 0  ;;  %s2253_s0 = inlined_call_operand.vmem [shape: f32[2,4,342], index: 0, kind: input, shape index: {}]   ;;  %s2254_s1 = inlined_call_operand.vmem [shape: f32[3,3,8,4], index: 1, kind: input, shape index: {}]   ;;  %s2255_s2 = inlined_call_operand.vmem [shape: f32[8,1], index: 2, kind: input, shape index: {}]   ;;  %s2256_s3 = inlined_call_operand.hbm [shape: f32[2,8,288], index: 3, kind: output, shape index: {}]  }
   0x1   :  { %10 = vsyncpa [#allocation3 + $0x1], 0  ;;  %s2036_s12 = smov 0   ;;  %s2038_s13 = smov 0  }
   0x2   :  { %s2040_s14 = smov 0   ;;  %s2042_s15 = smov 0  }
   0x3 LB: > { %s2057_s16 = sadd.s32 4294967295, %s2002_s15   ;;  %s1726_s17 = sadd.s32 4294967294, %s2002_s15   ;;  %s2002_s15 = sphi %s2042_s15, %s2262_s15   ;;  %s1998_s14 = sphi %s2040_s14, %s2261_s14   ;;  %s1994_s13 = sphi %s2038_s13, %s2260_s13   ;;  %s1990_s12 = sphi %s2036_s12, %s2259_s12  }
   0x4   : > { %s2061_s18 = sadd.s32 1, %s2002_s15   ;;  %s91_s19 = sadd.s32 1, %s1998_s14 }
   0x5   : > { %s88_s20 = ssub.s32 %s2002_s15, %s2061_s18  ;;  %p101_p0 = scmp.ne.s32.totalorder %s1998_s14, %s1994_s13 }
   0x6   : > { %p89_p1 = scmp.eq.s32.totalorder %s88_s20, 0  ;;  %p102_p2 = scmp.eq.s32.totalorder %s2057_s16, 1 }
   0x7   : > { %p107_p3 = scmp.ne.s32.totalorder %s1994_s13, %s1990_s12  ;;  %p108_p4 = scmp.eq.s32.totalorder %s1726_s17, 1 }
   0x8   : > { %s2072_s21 = scalar_select %p89_p1, %s1998_s14, %s91_s19  }
   0x9   : > { %p2074_p5 = por %p102_p2, %p101_p0  ;;  %p2078_p6 = por %p108_p4, %p107_p3 }
   0xa   : > { %p1729_p7 = scmp.ge.s32.totalorder %s2002_s15, 1  ;;  %p140_p8 = scmp.lt.s32.totalorder %s2002_s15, 3 }
   0xc   : > { %p141_p9 = pnand %p1729_p7, %p140_p8 }
   0xd   : > { %p164_p10 = scmp.lt.s32.totalorder (!%p141_p9), %s2057_s16, 1  ;;  %v2004_v0 = vmov (!%p141_p9), 0.0   ;;  %vm2005_vm0 = vmmov (!%p141_p9), 0   ;;  %vm185_vm1 = vcmask (!%p141_p9), 1043456   ;;  %v177_v1 = vld [vmem:[%s2254_s1] sm:$0xff] (!%p141_p9)  ;;  %vm181_vm2 = vcmask (!%p141_p9), 31744  }
   0xe   : > { %144 = sbr.rel (%p141_p9) target bundleno = 436 (0x1b4), region = 32  ;;  %1805 = vmatprep.subr.mxu1 (!%p141_p9), %v2004_v0  ;;  %1807 = vmatprep.mubr.msk.f32.mxu1 (!%p141_p9), %vm2005_vm0, %v2004_v0  ;;  %s2006_s4 = smov (!%p141_p9), 127   ;;  %v171_v5 = vld [vmem:[%s2255_s2] sm:$0xff] (!%p141_p9)  ;;  %v2014_v6 = vmov (!%p141_p9), 0   ;;  %vm344_vm3 = vcmask (!%p141_p9), 1039360   ;;  %v1736_v10 = vld [vmem:[%s2254_s1 + $0x8] sm:$0xff] (!%p141_p9) }
   0xf   : > { %256 = vmatprep.mubr.f32.mxu0 (!%p141_p9), %v2004_v0  ;;  %s2007_s5 = smov (!%p141_p9), 126   ;;  %s2008_s6 = smov (!%p141_p9), 110   ;;  %1938 = vset.pattern.permute.xlu0 (!%p141_p9), %v2014_v6  ;;  %vm508_vm4 = vcmask (!%p141_p9), 1031168   ;;  %vm672_vm5 = vcmask (!%p141_p9), 900096   ;;  %v1742_v19 = vld [vmem:[%s2254_s1 + $0x10] sm:$0xff] (!%p141_p9)  ;;  %vm836_vm6 = vcmask (!%p141_p9), 891904  }
  0x10   : > { %s2009_s7 = smov (!%p141_p9), 109   ;;  %s2010_s8 = smov (!%p141_p9), 108   ;;  %v1748_v26 = vld [vmem:[%s2254_s1 + $0x18] sm:$0xff] (!%p141_p9)  ;;  %vm1000_vm7 = vcmask (!%p141_p9), 883712   ;;  %v1754_v34 = vld [vmem:[%s2254_s1 + $0x20] sm:$0xff] (!%p141_p9)  ;;  %vm1164_vm8 = vcmask (!%p141_p9), 752640  }
  0x11   : > { %s2011_s9 = smov (!%p141_p9), 92   ;;  %s2012_s10 = smov (!%p141_p9), 91   ;;  %v1760_v40 = vld [vmem:[%s2254_s1 + $0x28] sm:$0xff] (!%p141_p9)  ;;  %vm1328_vm9 = vcmask (!%p141_p9), 744448   ;;  %v1766_v46 = vld [vmem:[%s2254_s1 + $0x30] sm:$0xff] (!%p141_p9)  ;;  %vm1492_vm10 = vcmask (!%p141_p9), 736256  }
  0x12   : > { %s2013_s11 = smov (!%p141_p9), 90   ;;  %v1772_v51 = vld [vmem:[%s2254_s1 + $0x38] sm:$0xff] (!%p141_p9)  ;;  %v1778_v54 = vld [vmem:[%s2254_s1 + $0x40] sm:$0xff] (!%p141_p9)  ;;  %s161_s17 = sand.u32 (!%p141_p9), 1, %s1994_s13   ;;  %vm1650_vm11 = vcmask (!%p141_p9), 261120  }
  0x13   : > { %s1885_s19 = smul.u32 (!%p141_p9), 24, %s161_s17  ;;  %s2015_s30 = smov (!%p141_p9), [#allocation2]  }
  0x14   : > { %s1887_s20 = smul.u32 (!%p141_p9), 384, %s2057_s16 }
  0x15   : > { %s165_s24 = scalar_select %p164_p10, %s2057_s16, 1 }
  0x16   : > { %s1653_s16 = scalar_lea.sflag [#allocation3], %s161_s17 }
  0x17   : > { %s1886_s25 = smul.u32 12, %s165_s24  ;;  %s163_s24 = scalar_lea.vmem [#allocation2], %s1885_s19 }
  0x19   : > { %s168_s28 = scalar_lea.vmem %s2253_s0, %s1886_s25  ;;  %s1667_s25 = sshll.u32 %s163_s24, 4  ;;  %s2213_s25 = int_to_ptr.vmem [resolvable:$true] %s1667_s25 }
  0x1a   : > { %v169_v2 = vld [vmem:[%s168_s28] sm:$0xff]  ;;  %v170_v3 = vld [vmem:[%s168_s28 + $0x8] sm:$0xf]  ;;  %s2211_s28 = scalar_lea.hbm %s2256_s3, %s1887_s20  ;;  %s1940_s29 = scalar_lea.vmem %s2213_s25, 384 }
  0x1b   : > { %338 = vrot.lane.b32.xlu1 %v169_v2, %s2006_s4  ;;  %v180_v4 = vcombine.high %v169_v2, %v169_v2  ;;  %1806 = vmatpush3.msk.msra.mxu1 %vm185_vm1, %v170_v3  ;;  %p1941_p11 = scmp.ne.s32.totalorder %s2213_s25, %s1940_s29 }
  0x1c   : > { %1808 = vmatmul.mubr.msk.f32.vlgmr.msra.gmra.mrb[0].mxu1 %vm181_vm2, %v177_v1  ;;  %1810 = vmatprep.subr.mxu1 %v2004_v0 }
  0x1d   : > { %340 = vrot.lane.b32.xlu0 %v180_v4, %s2006_s4  ;;  %1731 = vmatprep.subr.msk.mxu0 %vm185_vm1, %v180_v4  ;;  %p1942_p12 = pnand %p1941_p11, %p2074_p5 }
  0x1e   : > { %1732 = vmatpush1.msk.msra.mxu0 %vm185_vm1, %v169_v2  ;;  %1812 = vmatprep.mubr.msk.f32.mxu1 %vm2005_vm0, %v2004_v0 }
  0x1f   : > { %504 = vrot.lane.b32.xlu1 %v180_v4, %s2007_s5  ;;  %1733 = vmatmul.mubr.msk.f32.vlgmr.msra.gmra.mrb[0].mxu0 %vm181_vm2, %v177_v1  ;;  %p1943_p13 = pneg %p1942_p12 }
  0x20   : > { %420 = vmatprep.mubr.f32.mxu0 %v2004_v0 }
  0x21   : > { %342 = vrot.lane.b32.xlu0 %v170_v3, %s2006_s4  ;;  %s1944_s4 = sshll.u32 %s2015_s30, 4  ;;  %s1945_s4 = int_to_ptr.vmem [resolvable:$false] %s1944_s4 }
  0x22   : > { %p1947_p0 = scmp.lt.s32.totalorder %s2213_s25, %s1945_s4 }
  0x23   : > { %502 = vrot.lane.b32.xlu1 %v169_v2, %s2007_s5 }
  0x25   : > { %506 = vrot.lane.b32.xlu0 %v170_v3, %s2007_s5  ;;  %s1946_s5 = scalar_lea.vmem %s1945_s4, 768 }
  0x26   : > { %p1948_p1 = scmp.lt.s32.totalorder %s1946_s5, %s1940_s29 }
  0x27   : > { %670 = vrot.lane.b32.xlu1 %v170_v3, %s2008_s6 }
  0x28   : > { %p1949_p2 = por %p1948_p1, %p1947_p0 }
  0x29   : > { %668 = vrot.lane.b32.xlu0 %v180_v4, %s2008_s6 }
  0x2a   : > { %p1950_p3 = pnand %p1949_p2, %p1943_p13 }
  0x2b   : > { %832 = vrot.lane.b32.xlu1 %v180_v4, %s2009_s7 }
  0x2d   : > { %666 = vrot.lane.b32.xlu0 %v169_v2, %s2008_s6 }
  0x2f   : > { %830 = vrot.lane.b32.xlu1 %v169_v2, %s2009_s7 }
  0x31   : > { %834 = vrot.lane.b32.xlu0 %v170_v3, %s2009_s7 }
  0x33   : > { %998 = vrot.lane.b32.xlu1 %v170_v3, %s2010_s8 }
  0x35   : > { %996 = vrot.lane.b32.xlu0 %v180_v4, %s2010_s8 }
  0x37   : > { %1160 = vrot.lane.b32.xlu1 %v180_v4, %s2011_s9 }
  0x39   : > { %994 = vrot.lane.b32.xlu0 %v169_v2, %s2010_s8 }
  0x3b   : > { %1158 = vrot.lane.b32.xlu1 %v169_v2, %s2011_s9 }
  0x3d   : > { %1162 = vrot.lane.b32.xlu0 %v170_v3, %s2011_s9 }
  0x3f   : > { %1326 = vrot.lane.b32.xlu1 %v170_v3, %s2012_s10 }
  0x41   : > { %1324 = vrot.lane.b32.xlu0 %v180_v4, %s2012_s10 }
  0x43   : > { %1488 = vrot.lane.b32.xlu1 %v180_v4, %s2013_s11 }
  0x45   : > { %1322 = vrot.lane.b32.xlu0 %v169_v2, %s2012_s10 }
  0x47   : > { %1486 = vrot.lane.b32.xlu1 %v169_v2, %s2013_s11 }
  0x49   : > { %1490 = vrot.lane.b32.xlu0 %v170_v3, %s2013_s11 }
  0x4d   : > { %174 = vperm.xlu0 %1938, %v171_v5  }
  0x8d   : > { %v339_v7 = vpop.permute.xlu1 %338 }
  0x8f   : > { %v341_v8 = vpop.permute.xlu0 %340 }
  0x90   : > { %v345_v13 = vsel %vm344_vm3, %v339_v7, %v341_v8 }
  0x91   : > { %v505_v9 = vpop.permute.xlu1 %504 }
  0x93   : > { %v343_v11 = vpop.permute.xlu0 %342 }
  0x94   : > { %v346_v12 = vsel %vm344_vm3, %v341_v8, %v343_v11  ;;  %1811 = vmatpush3.msk.msra.mxu1 %vm185_vm1, %v343_v11 }
  0x95   : > { %1737 = vmatprep.subr.msk.mxu0 %vm185_vm1, %v346_v12  ;;  %1813 = vmatmul.mubr.msk.f32.vlgmr.msra.gmra.mrb[0].mxu1 %vm181_vm2, %v1736_v10  ;;  %v503_v14 = vpop.permute.xlu1 %502 }
  0x96   : > { %1738 = vmatpush1.msk.msra.mxu0 %vm185_vm1, %v345_v13  ;;  %1815 = vmatprep.subr.mxu1 %v2004_v0  ;;  %v509_v16 = vsel %vm508_vm4, %v503_v14, %v505_v9 }
  0x97   : > { %v507_v15 = vpop.permute.xlu0 %506  ;;  %1739 = vmatmul.mubr.msk.f32.vlgmr.msra.gmra.mrb[0].mxu0 %vm181_vm2, %v1736_v10  ;;  %1817 = vmatprep.mubr.msk.f32.mxu1 %vm2005_vm0, %v2004_v0 }
  0x98   : > { %v510_v17 = vsel %vm508_vm4, %v505_v9, %v507_v15  ;;  %1816 = vmatpush3.msk.msra.mxu1 %vm185_vm1, %v507_v15  ;;  %584 = vmatprep.mubr.f32.mxu0 %v2004_v0 }
  0x99   : > { %1743 = vmatprep.subr.msk.mxu0 %vm185_vm1, %v510_v17  ;;  %v671_v18 = vpop.permute.xlu1 %670  ;;  %1820 = vmatprep.subr.mxu1 %v2004_v0 }
  0x9a   : > { %1744 = vmatpush1.msk.msra.mxu0 %vm185_vm1, %v509_v16 }
  0x9b   : > { %v669_v20 = vpop.permute.xlu0 %668 }
  0x9c   : > { %v674_v21 = vsel %vm672_vm5, %v669_v20, %v671_v18 }
  0x9d   : > { %1818 = vmatmul.mubr.msk.f32.vlgmr.msra.gmra.mrb[0].mxu1 %vm181_vm2, %v1742_v19  ;;  %1749 = vmatprep.subr.msk.mxu0 %vm185_vm1, %v674_v21  ;;  %v833_v22 = vpop.permute.xlu1 %832 }
  0x9e   : > { %1821 = vmatpush3.msk.msra.mxu1 %vm185_vm1, %v671_v18  ;;  %1822 = vmatprep.mubr.msk.f32.mxu1 %vm2005_vm0, %v2004_v0 }
  0x9f   : > { %1745 = vmatmul.mubr.msk.f32.vlgmr.msra.gmra.mrb[0].mxu0 %vm181_vm2, %v1742_v19  ;;  %v667_v23 = vpop.permute.xlu0 %666  ;;  %1825 = vmatprep.subr.mxu1 %v2004_v0 }
  0xa0   : > { %v673_v24 = vsel %vm672_vm5, %v667_v23, %v669_v20  ;;  %748 = vmatprep.mubr.f32.mxu0 %v2004_v0 }
  0xa1   : > { %1750 = vmatpush1.msk.msra.mxu0 %vm185_vm1, %v673_v24  ;;  %v831_v25 = vpop.permute.xlu1 %830 }
  0xa2   : > { %v837_v29 = vsel %vm836_vm6, %v831_v25, %v833_v22 }
  0xa3   : > { %v835_v27 = vpop.permute.xlu0 %834 }
  0xa4   : > { %v838_v28 = vsel %vm836_vm6, %v833_v22, %v835_v27 }
  0xa5   : > { %1823 = vmatmul.mubr.msk.f32.vlgmr.msra.gmra.mrb[0].mxu1 %vm181_vm2, %v1748_v26  ;;  %1755 = vmatprep.subr.msk.mxu0 %vm185_vm1, %v838_v28  ;;  %v999_v30 = vpop.permute.xlu1 %998 }
  0xa6   : > { %1826 = vmatpush3.msk.msra.mxu1 %vm185_vm1, %v835_v27  ;;  %1827 = vmatprep.mubr.msk.f32.mxu1 %vm2005_vm0, %v2004_v0 }
  0xa7   : > { %1751 = vmatmul.mubr.msk.f32.vlgmr.msra.gmra.mrb[0].mxu0 %vm181_vm2, %v1748_v26  ;;  %v997_v31 = vpop.permute.xlu0 %996  ;;  %1830 = vmatprep.subr.mxu1 %v2004_v0 }
  0xa8   : > { %1756 = vmatpush1.msk.msra.mxu0 %vm185_vm1, %v837_v29  ;;  %912 = vmatprep.mubr.f32.mxu0 %v2004_v0  ;;  %v1002_v32 = vsel %vm1000_vm7, %v997_v31, %v999_v30 }
  0xa9   : > { %1761 = vmatprep.subr.msk.mxu0 %vm185_vm1, %v1002_v32  ;;  %v1161_v33 = vpop.permute.xlu1 %1160 }
  0xab   : > { %v995_v35 = vpop.permute.xlu0 %994 }
  0xac   : > { %v1001_v36 = vsel %vm1000_vm7, %v995_v35, %v997_v31 }
  0xad   : > { %1828 = vmatmul.mubr.msk.f32.vlgmr.msra.gmra.mrb[0].mxu1 %vm181_vm2, %v1754_v34  ;;  %v1159_v38 = vpop.permute.xlu1 %1158 }
  0xae   : > { %1831 = vmatpush3.msk.msra.mxu1 %vm185_vm1, %v999_v30  ;;  %1832 = vmatprep.mubr.msk.f32.mxu1 %vm2005_vm0, %v2004_v0  ;;  %v1165_v43 = vsel %vm1164_vm8, %v1159_v38, %v1161_v33 }
  0xaf   : > { %1757 = vmatmul.mubr.msk.f32.vlgmr.msra.gmra.mrb[0].mxu0 %vm181_vm2, %v1754_v34  ;;  %v1163_v37 = vpop.permute.xlu0 %1162  ;;  %1835 = vmatprep.subr.mxu1 %v2004_v0 }
  0xb0   : > { %1762 = vmatpush1.msk.msra.mxu0 %vm185_vm1, %v1001_v36  ;;  %1076 = vmatprep.mubr.f32.mxu0 %v2004_v0  ;;  %v1166_v39 = vsel %vm1164_vm8, %v1161_v33, %v1163_v37 }
  0xb1   : > { %1767 = vmatprep.subr.msk.mxu0 %vm185_vm1, %v1166_v39  ;;  %v1327_v42 = vpop.permute.xlu1 %1326 }
  0xb3   : > { %v1325_v41 = vpop.permute.xlu0 %1324 }
  0xb4   : > { %v1330_v44 = vsel %vm1328_vm9, %v1325_v41, %v1327_v42 }
  0xb5   : > { %1833 = vmatmul.mubr.msk.f32.vlgmr.msra.gmra.mrb[0].mxu1 %vm181_vm2, %v1760_v40  ;;  %v1489_v48 = vpop.permute.xlu1 %1488 }
  0xb6   : > { %1836 = vmatpush3.msk.msra.mxu1 %vm185_vm1, %v1163_v37  ;;  %1837 = vmatprep.mubr.msk.f32.mxu1 %vm2005_vm0, %v2004_v0 }
  0xb7   : > { %1763 = vmatmul.mubr.msk.f32.vlgmr.msra.gmra.mrb[0].mxu0 %vm181_vm2, %v1760_v40  ;;  %v1323_v45 = vpop.permute.xlu0 %1322  ;;  %1840 = vmatprep.subr.mxu1 %v2004_v0 }
  0xb8   : > { %1768 = vmatpush1.msk.msra.mxu0 %vm185_vm1, %v1165_v43  ;;  %1240 = vmatprep.mubr.f32.mxu0 %v2004_v0  ;;  %v1329_v49 = vsel %vm1328_vm9, %v1323_v45, %v1325_v41 }
  0xb9   : > { %1773 = vmatprep.subr.msk.mxu0 %vm185_vm1, %v1330_v44  ;;  %v1487_v52 = vpop.permute.xlu1 %1486 }
  0xba   : > { %v1493_v53 = vsel %vm1492_vm10, %v1487_v52, %v1489_v48 }
  0xbb   : > { %v1491_v47 = vpop.permute.xlu0 %1490 }
  0xbc   : > { %v1494_v50 = vsel %vm1492_vm10, %v1489_v48, %v1491_v47 }
  0xbd   : > { %1838 = vmatmul.mubr.msk.f32.vlgmr.msra.gmra.mrb[0].mxu1 %vm181_vm2, %v1766_v46 }
  0xbe   : > { %1841 = vmatpush3.msk.msra.mxu1 %vm185_vm1, %v1327_v42  ;;  %1842 = vmatprep.mubr.msk.f32.mxu1 %vm2005_vm0, %v2004_v0 }
  0xbf   : > { %1769 = vmatmul.mubr.msk.f32.vlgmr.msra.gmra.mrb[0].mxu0 %vm181_vm2, %v1766_v46  ;;  %1845 = vmatprep.subr.mxu1 %v2004_v0 }
  0xc0   : > { %1774 = vmatpush1.msk.msra.mxu0 %vm185_vm1, %v1329_v49  ;;  %1404 = vmatprep.mubr.f32.mxu0 %v2004_v0 }
  0xc1   : > { %1779 = vmatprep.subr.msk.mxu0 %vm185_vm1, %v1494_v50 }
  0xc5   : > { %1843 = vmatmul.mubr.msk.f32.vlgmr.msra.gmra.mrb[0].mxu1 %vm181_vm2, %v1772_v51 }
  0xc6   : > { %1846 = vmatpush3.msk.msra.mxu1 %vm185_vm1, %v1491_v47  ;;  %1847 = vmatprep.mubr.msk.f32.mxu1 %vm2005_vm0, %v2004_v0 }
  0xc7   : > { %1775 = vmatmul.mubr.msk.f32.vlgmr.msra.gmra.mrb[0].mxu0 %vm181_vm2, %v1772_v51 }
  0xc8   : > { %1780 = vmatpush1.msk.msra.mxu0 %vm185_vm1, %v1493_v53  ;;  %1568 = vmatprep.mubr.f32.mxu0 %v2004_v0 }
  0xcc   : > { %v175_v55 = vpop.permute.xlu0 %174 }
  0xcd   : > { %1848 = vmatmul.mubr.msk.f32.vlgmr.msra.gmra.mrb[0].mxu1 %vm181_vm2, %v1778_v54 }
  0xcf   : > { %1781 = vmatmul.mubr.msk.f32.vlgmr.msra.gmra.mrb[0].mxu0 %vm181_vm2, %v1778_v54 }
 0x1a0   : > { %v1641_v56 = vpop.f32.mrb[0].mxu1 }
 0x1a1   : > { %v1852_v57 = vadd.f32 %v1641_v56, %v175_v55  ;;  %v1849_v58 = vpop.f32.mrb[1].mxu1 }
 0x1a2   : > { %v1570_v59 = vpop.f32.mrb[0].mxu0 }
 0x1a3   : > { %1651 = vst.msk [vmem:[%s163_s24 + $0x10] sm:$0xff] %vm1650_vm11, %v1852_v57  ;;  %v1850_v60 = vadd.f32 %v1570_v59, %v175_v55  ;;  %v1572_v61 = vpop.f32.mrb[1].mxu0 }
 0x1a4   : > { %v1851_v62 = vadd.f32 %v1572_v61, %v175_v55 }
 0x1a5   : > { %1648 = vst [vmem:[%s163_s24] sm:$0xff] %v1850_v60 }
 0x1a6   : > { %1649 = vst [vmem:[%s163_s24 + $0x8] sm:$0xff] %v1851_v62 }
 0x1a7   : > { %1953 = shalt.err (!%p1950_p3)
}
 0x1a8   : > { %s1954_s6 = scalar_lea.hbm %s2211_s28, 384  ;;  %s1958_s9 = scalar_lea.hbm %s2256_s3, 768 }
 0x1a9   : > { %p1955_p4 = scmp.ne.s32.totalorder %s2211_s28, %s1954_s6  ;;  %p1959_p9 = scmp.lt.u32.totalorder %s2211_s28, %s2256_s3 }
 0x1aa   : > { %p1960_p10 = scmp.lt.u32.totalorder %s1958_s9, %s1954_s6  ;;  %p1962_p12 = scmp.lt.u32.totalorder %s1954_s6, %s2211_s28 }
 0x1ab   : > { %p1956_p7 = pnand %p1955_p4, %p2074_p5 }
 0x1ac   : > { %p1961_p11 = por %p1960_p10, %p1959_p9 }
 0x1ad   : > { %p1957_p8 = pneg %p1956_p7 }
 0x1ae   : > { %p1963_p13 = por %p1962_p12, %p1961_p11 }
 0x1b0   : > { %p1964_p0 = pnand %p1963_p13, %p1957_p8 }
 0x1b2   : > { %1967 = shalt.err (!%p1964_p0)
}
 0x1b3   : > { %1888 = dma.vmem_to_hbm [thread:$0]  (%p2074_p5), %s2213_s25, 384, %s2211_s28, %s1653_s16  }
 0x1b4 PF: > { %p1894_p1 = scmp.ge.s32.totalorder %s2002_s15, 2  ;;  %s1679_s17 = sand.u32 1, %s1990_s12  }
 0x1b5   : > { %s1680_s19 = scalar_lea.sflag [#allocation3], %s1679_s17 }
 0x1b6   : > { %p1891_p2 = pnand %p1894_p1, %p2078_p6 }
 0x1b8   : > { %1985 = dma.done.wait (!%p1891_p2), %s1680_s19, 384  }
 0x1b9   : > { %1987 = vsyncadd (!%p1891_p2), %s1680_s19, 4294966912  ;;  %p13_p3 = scmp.ge.s32.totalorder %s2061_s18, 4   ;;  %s2259_s12 = smov %s1994_s13 }
 0x1ba   : > { %s2260_s13 = smov %s1998_s14  ;;  %s2261_s14 = smov %s2072_s21 }
 0x1bb   : > { %s2262_s15 = smov %s2061_s18  ;;  %15 = sbr.rel (!%p13_p3) target bundleno = 3 (0x3), region = 75 }
 0x1c2   :  { %1685 = vsyncpa [#allocation3], 1 }
 0x1c3   :  { %1687 = vsyncpa [#allocation3 + $0x1], 1 }

</bundles_post_ra>
